<compile_context>
chip_gen: v7x
topology: tpu7x:2x2x1
jax: 0.10.0
libtpu: 0.0.40
codegen_flags: <defaults>
</compile_context>

<pallas_src>
import functools
import math

import jax
import jax.numpy as jnp
from jax.experimental import pallas as pl
from jax.experimental.pallas import tpu as pltpu

_LANES = 128          # lane width; outputs padded to this so stores are unmasked
_REFRESH_EVERY = 16   # re-derive the softmax denominator every N decode steps


def _decoder_kernel(x_ref, wqk_ref, vcol_ref, stats_ref, reloc_ref,
                    *, max_retrievals, refresh_every=_REFRESH_EVERY):
    # x block: (Bt, N, D) — Bt batch rows per grid step, nodes on sublanes,
    # hidden on lanes.  Compute in f32 regardless of the input dtype.
    x = x_ref[...].astype(jnp.float32)
    Bt, N, D = x.shape

    # ---- projections (K and V projections folded away in the wrapper) ------
    # logits0[b, n] = (mean_n x[b] @ Wq) . (x[b, n] @ Wk)
    #              = (mean_n x[b] @ (Wq @ Wk^T)) . x[b, n]     (no K, no K.T)
    q0 = jnp.mean(x, axis=1)                                          # (Bt, D)
    qk = jnp.dot(q0, wqk_ref[...].astype(jnp.float32),
                 preferred_element_type=jnp.float32)                  # (Bt, D)

    scale = 1.0 / math.sqrt(float(D))
    # Contraction over D on the VPU (broadcast-mul + lane reduce); keeps the
    # (batch-on-sublane, node-on-lane) layout with no transposes.
    logits0 = jnp.sum(x * qk[:, None, :], axis=-1) * scale            # (Bt, N)

    # node value = mean_j (x @ Wv)[., j] = x @ mean_j(Wv)   (V projection gone)
    node_val = jnp.sum(
        x * vcol_ref[...].astype(jnp.float32)[None, :, :], axis=-1)   # (Bt, N)

    iota_n = jax.lax.broadcasted_iota(jnp.int32, (Bt, N), 1)          # (Bt, N)
    RL = reloc_ref.shape[-1]
    iota_r = jax.lax.broadcasted_iota(jnp.int32, (1, RL), 1)          # (1, RL)
    neg_big = jnp.float32(-1e30)

    # ---- softmax bookkeeping hoisted out of the decode loop ----------------
    mx0 = jnp.max(logits0, axis=-1, keepdims=True)                    # (Bt, 1)
    exp0 = jnp.exp(logits0 - mx0)                                     # (Bt, N) once
    S0 = jnp.sum(exp0, axis=-1, keepdims=True)                        # (Bt, 1)

    def make_step(start):
        def step(i, carry):
            avail, ll, S, reloc = carry
            t = start + i
            logits = jnp.where(avail, logits0, neg_big)               # (Bt, N)
            mx_t = jnp.max(logits, axis=-1, keepdims=True)            # (Bt, 1)

            # Greedy pick has logp[sel] = -log(z_t) with
            #   z_t = sum_avail exp(logits - mx_t) = exp(mx0 - mx_t) * S
            ll = ll + (mx_t - mx0) - jnp.log(S)                       # (Bt, 1)

            # argmax (first max wins) — one lane min-reduce
            sel = jnp.min(jnp.where(logits >= mx_t, iota_n, N),
                          axis=-1, keepdims=True).astype(jnp.int32)   # (Bt, 1)

            reloc = jnp.where(iota_r == t, sel, reloc)                # (Bt, RL)
            avail = jnp.logical_and(avail, iota_n != sel)             # (Bt, N)
            S = S - jnp.exp(mx_t - mx0)                               # (Bt, 1)
            return avail, ll, S, reloc
        return step

    avail = jnp.ones((Bt, N), jnp.bool_)
    ll = jnp.zeros((Bt, 1), jnp.float32)
    reloc = jnp.zeros((Bt, RL), jnp.int32)
    S = S0

    T = int(max_retrievals)
    for start in range(0, T, refresh_every):
        count = min(refresh_every, T - start)
        if start > 0:
            # periodic exact refresh of the running denominator (f32 safety)
            S = jnp.sum(jnp.where(avail, exp0, 0.0), axis=-1, keepdims=True)
        avail, ll, S, reloc = jax.lax.fori_loop(
            0, count, make_step(start), (avail, ll, S, reloc), unroll=True)

    # cost / wt_lb derived once after the loop (retrieved nodes == ~avail)
    total = jnp.sum(node_val, axis=-1, keepdims=True)                 # (Bt, 1)
    cost = jnp.sum(jnp.where(avail, 0.0, node_val),
                   axis=-1, keepdims=True)                            # (Bt, 1)
    wt_lb = total - cost

    # Lane-dense fused scalar output: col 0 = cost, col 1 = ll, col 2 = wt_lb.
    lane = jax.lax.broadcasted_iota(jnp.int32, (Bt, stats_ref.shape[-1]), 1)
    stats_ref[...] = (jnp.where(lane == 0, cost, 0.0)
                      + jnp.where(lane == 1, ll, 0.0)
                      + jnp.where(lane == 2, wt_lb, 0.0))
    reloc_ref[...] = reloc


def _vmem_limit_bytes():
    """Per-generation scoped-VMEM budget (v7x: 48 MiB, v5e/v6e: 96 MiB)."""
    try:
        cap = int(pltpu.get_tpu_info().vmem_capacity_bytes)
    except Exception:
        cap = 64 * 1024 * 1024          # conservative fallback (v7x-sized)
    if cap <= 64 * 1024 * 1024:
        return 48 * 1024 * 1024
    return 96 * 1024 * 1024


def _pick_block_b(B, N, D, itemsize, vmem_limit):
    """Largest batch tile whose double-buffered x slab fits in ~half the budget."""
    Bp8 = pl.cdiv(B, 8) * 8
    bytes_per_row = 2 * N * D * itemsize            # 2x for double buffering
    bb = (vmem_limit // 2) // max(1, bytes_per_row)
    bb = int(min(256, max(8, (bb // 8) * 8)))
    bb = min(bb, Bp8)
    # Keep >= 2 grid steps when there is enough work so a 2-TC chip (v7x) can
    # shard the "parallel" batch axis across both cores.
    if Bp8 >= 16 and pl.cdiv(Bp8, bb) < 2:
        bb = max(8, ((pl.cdiv(Bp8, 2) + 7) // 8) * 8)
    return bb


def decoder_forward(x, wqk, vcol, max_retrievals, *, block_b=None):
    """x: [B, N, D]; wqk: [D, D] = Wq @ Wk^T; vcol: [1, D] = mean(Wv, 1).

    Returns (cost [B], ll [B], reloc [B, T] int32, wt_lb [B]).
    """
    B, N, D = x.shape
    T = int(max_retrievals)
    assert T <= N, "max_retrievals must not exceed the number of nodes"

    vmem_limit = _vmem_limit_bytes()
    if block_b is None:
        block_b = _pick_block_b(B, N, D, jnp.dtype(x.dtype).itemsize, vmem_limit)

    # Batch-block the grid; pad B up to a multiple of block_b.
    Bp = pl.cdiv(B, block_b) * block_b
    if Bp != B:
        x = jnp.pad(x, ((0, Bp - B), (0, 0), (0, 0)))

    kernel = functools.partial(_decoder_kernel, max_retrievals=T)

    stats, reloc = pl.pallas_call(
        kernel,
        out_shape=(
            jax.ShapeDtypeStruct((Bp, _LANES), jnp.float32),   # fused cost/ll/wt_lb
            jax.ShapeDtypeStruct((Bp, _LANES), jnp.int32),     # reloc (lane-padded)
        ),
        grid_spec=pltpu.PrefetchScalarGridSpec(
            num_scalar_prefetch=0,
            grid=(Bp // block_b,),
            in_specs=[
                pl.BlockSpec((block_b, N, D), lambda b: (b, 0, 0)),   # x
                pl.BlockSpec((D, D), lambda b: (0, 0)),               # Wq @ Wk^T
                pl.BlockSpec((1, D), lambda b: (0, 0)),               # mean(Wv, 1)
            ],
            out_specs=[
                pl.BlockSpec((block_b, _LANES), lambda b: (b, 0)),    # stats
                pl.BlockSpec((block_b, _LANES), lambda b: (b, 0)),    # reloc
            ],
        ),
        compiler_params=pltpu.CompilerParams(
            dimension_semantics=("parallel",),
            vmem_limit_bytes=vmem_limit),
    )(x, wqk, vcol)

    cost = stats[:B, 0]
    ll = stats[:B, 1]
    wt_lb = stats[:B, 2]
    reloc_out = reloc[:B, :T]
    return cost, ll, reloc_out, wt_lb


class Model:
    """JAX/Pallas counterpart of the PyTorch `Model` wrapper."""

    def __init__(self, hidden, key):
        k1, k2, k3 = jax.random.split(key, 3)
        s = 1.0 / math.sqrt(hidden)
        self.wk = jax.random.normal(k1, (hidden, hidden), jnp.float32) * s
        self.wq = jax.random.normal(k2, (hidden, hidden), jnp.float32) * s
        self.wv = jax.random.normal(k3, (hidden, hidden), jnp.float32) * s
        # Fold the projections once outside the kernel (removes the in-kernel
        # K/V matmuls and the K transpose entirely).
        self.wqk = jnp.dot(self.wq, self.wk.T)            # (D, D)
        self.vcol = jnp.mean(self.wv, axis=1)[None, :]    # (1, D)

    def forward(self, x, max_retrievals):
        cost, ll, reloc, wt_lb = decoder_forward(
            x, self.wqk, self.vcol, max_retrievals)
        return (cost, ll, reloc, wt_lb)


if __name__ == "__main__":
    B, N, D = 2, 8, 32       # batch, num_nodes (seq), hidden
    T = 4                    # max_retrievals

    key = jax.random.PRNGKey(0)
    kx, kp = jax.random.split(key)
    x = jax.random.normal(kx, (B, N, D), jnp.float32)

    model = Model(hidden=D, key=kp)
    cost, ll, reloc, wt_lb = model.forward(x, T)

    jax.block_until_ready((cost, ll, reloc, wt_lb))
    assert cost.shape == (B,) and ll.shape == (B,)
    assert reloc.shape == (B, T) and reloc.dtype == jnp.int32
    assert wt_lb.shape == (B,)
    assert bool(jnp.all(jnp.isfinite(cost))) and bool(jnp.all(jnp.isfinite(ll)))
    assert bool(jnp.all(jnp.isfinite(wt_lb)))
    assert bool(jnp.all((reloc >= 0) & (reloc < N)))
    print("KERNEL_OK")
</pallas_src>

<mosaic_0001>
module attributes {stable_mosaic.version = 11 : i64} {
  func.func @_decoder_kernel(%arg0: i32, %arg1: memref<8x8x32xf32, #tpu.memory_space<vmem>>, %arg2: memref<32x32xf32, #tpu.memory_space<vmem>>, %arg3: memref<1x32xf32, #tpu.memory_space<vmem>>, %arg4: memref<8x128xf32, #tpu.memory_space<vmem>>, %arg5: memref<8x128xi32, #tpu.memory_space<vmem>>) attributes {dimension_semantics = [#tpu.dimension_semantics<parallel>], iteration_bounds = array<i64: 1>, scalar_prefetch = 0 : i64, scratch_operands = 0 : i64, tpu.core_type = #tpu.core_type<tc>, window_params = [{transform_indices = @transform_0, window_bounds = array<i64: 8, 8, 32>}, {pipeline_mode = #tpu.pipeline_mode<synchronous>, transform_indices = @transform_1, window_bounds = array<i64: 32, 32>}, {pipeline_mode = #tpu.pipeline_mode<synchronous>, transform_indices = @transform_2, window_bounds = array<i64: 1, 32>}, {transform_indices = @transform_3, window_bounds = array<i64: 8, 128>}, {transform_indices = @transform_4, window_bounds = array<i64: 8, 128>}]} {
    %c0 = arith.constant 0 : index
    %c0_0 = arith.constant 0 : index
    %c0_1 = arith.constant 0 : index
    %0 = vector.load %arg1[%c0, %c0_0, %c0_1] : memref<8x8x32xf32, #tpu.memory_space<vmem>>, vector<8x8x32xf32>
    %cst = arith.constant dense<0.000000e+00> : vector<8x32xf32>
    %1 = vector.multi_reduction <add>, %0, %cst [1] : vector<8x8x32xf32> to vector<8x32xf32>
    %cst_2 = arith.constant 8.000000e+00 : f32
    %2 = vector.broadcast %cst_2 : f32 to vector<8x32xf32>
    %3 = arith.divf %1, %2 : vector<8x32xf32>
    %c0_3 = arith.constant 0 : index
    %c0_4 = arith.constant 0 : index
    %4 = vector.load %arg2[%c0_3, %c0_4] : memref<32x32xf32, #tpu.memory_space<vmem>>, vector<32x32xf32>
    %cst_5 = arith.constant dense<0.000000e+00> : vector<8x32xf32>
    %5 = tpu.matmul %3, %4, %cst_5 {dimension_numbers = #tpu.dot_dimension_numbers<[1], [0], [0], [1], [0, 0, 1, 1], [], []>} : vector<8x32xf32>, vector<32x32xf32>, vector<8x32xf32> -> vector<8x32xf32>
    %6 = vector.shape_cast %5 : vector<8x32xf32> to vector<8x1x32xf32>
    %7 = vector.broadcast %6 : vector<8x1x32xf32> to vector<8x8x32xf32>
    %8 = arith.mulf %0, %7 : vector<8x8x32xf32>
    %cst_6 = arith.constant dense<0.000000e+00> : vector<8x8xf32>
    %9 = vector.multi_reduction <add>, %8, %cst_6 [2] : vector<8x8x32xf32> to vector<8x8xf32>
    %cst_7 = arith.constant 0.176776692 : f32
    %10 = vector.broadcast %cst_7 : f32 to vector<8x8xf32>
    %11 = arith.mulf %9, %10 : vector<8x8xf32>
    %c0_8 = arith.constant 0 : index
    %c0_9 = arith.constant 0 : index
    %12 = vector.load %arg3[%c0_8, %c0_9] : memref<1x32xf32, #tpu.memory_space<vmem>>, vector<1x32xf32>
    %13 = vector.shape_cast %12 : vector<1x32xf32> to vector<1x1x32xf32>
    %14 = vector.broadcast %13 : vector<1x1x32xf32> to vector<8x8x32xf32>
    %15 = arith.mulf %0, %14 : vector<8x8x32xf32>
    %cst_10 = arith.constant dense<0.000000e+00> : vector<8x8xf32>
    %16 = vector.multi_reduction <add>, %15, %cst_10 [2] : vector<8x8x32xf32> to vector<8x8xf32>
    %17 = tpu.iota {dimensions = array<i32: 1>} : vector<8x8xi32>
    %18 = tpu.iota {dimensions = array<i32: 1>} : vector<1x128xi32>
    %cst_11 = arith.constant dense<0xFF800000> : vector<8xf32>
    %19 = vector.multi_reduction <maximumf>, %11, %cst_11 [1] : vector<8x8xf32> to vector<8xf32>
    %20 = vector.shape_cast %19 : vector<8xf32> to vector<8x1xf32>
    %21 = vector.broadcast %20 : vector<8x1xf32> to vector<8x8xf32>
    %22 = arith.subf %11, %21 : vector<8x8xf32>
    %23 = math.exp %22 : vector<8x8xf32>
    %cst_12 = arith.constant dense<0.000000e+00> : vector<8xf32>
    %24 = vector.multi_reduction <add>, %23, %cst_12 [1] : vector<8x8xf32> to vector<8xf32>
    %25 = vector.shape_cast %24 : vector<8xf32> to vector<8x1xf32>
    %true = arith.constant true
    %26 = vector.broadcast %true : i1 to vector<8x8xi1>
    %cst_13 = arith.constant 0.000000e+00 : f32
    %27 = vector.broadcast %cst_13 : f32 to vector<8x1xf32>
    %c0_i32 = arith.constant 0 : i32
    %28 = vector.broadcast %c0_i32 : i32 to vector<8x128xi32>
    %cst_14 = arith.constant -1.000000e+30 : f32
    %c0_i32_15 = arith.constant 0 : i32
    %c0_i32_16 = arith.constant 0 : i32
    %29 = arith.addi %c0_i32_16, %c0_i32_15 : i32
    %30 = vector.broadcast %cst_14 : f32 to vector<8x8xf32>
    %31 = arith.select %26, %11, %30 : vector<8x8xi1>, vector<8x8xf32>
    %cst_17 = arith.constant dense<0xFF800000> : vector<8xf32>
    %32 = vector.multi_reduction <maximumf>, %31, %cst_17 [1] : vector<8x8xf32> to vector<8xf32>
    %33 = vector.shape_cast %32 : vector<8xf32> to vector<8x1xf32>
    %34 = arith.subf %33, %20 : vector<8x1xf32>
    %35 = arith.addf %27, %34 : vector<8x1xf32>
    %36 = math.log %25 : vector<8x1xf32>
    %37 = arith.subf %35, %36 : vector<8x1xf32>
    %38 = vector.broadcast %33 : vector<8x1xf32> to vector<8x8xf32>
    %39 = arith.cmpf oge, %31, %38 : vector<8x8xf32>
    %c8_i32 = arith.constant 8 : i32
    %40 = vector.broadcast %c8_i32 : i32 to vector<8x8xi32>
    %41 = arith.select %39, %17, %40 : vector<8x8xi1>, vector<8x8xi32>
    %cst_18 = arith.constant dense<2147483647> : vector<8xi32>
    %42 = vector.multi_reduction <minsi>, %41, %cst_18 [1] : vector<8x8xi32> to vector<8xi32>
    %43 = vector.shape_cast %42 : vector<8xi32> to vector<8x1xi32>
    %44 = vector.broadcast %29 : i32 to vector<1x128xi32>
    %45 = arith.cmpi eq, %18, %44 : vector<1x128xi32>
    %46 = vector.shape_cast %45 : vector<1x128xi1> to vector<1x128xi1>
    %47 = vector.broadcast %46 : vector<1x128xi1> to vector<8x128xi1>
    %48 = vector.shape_cast %43 : vector<8x1xi32> to vector<8x1xi32>
    %49 = vector.broadcast %48 : vector<8x1xi32> to vector<8x128xi32>
    %50 = arith.select %47, %49, %28 : vector<8x128xi1>, vector<8x128xi32>
    %51 = vector.broadcast %43 : vector<8x1xi32> to vector<8x8xi32>
    %52 = arith.cmpi ne, %17, %51 : vector<8x8xi32>
    %53 = arith.andi %26, %52 : vector<8x8xi1>
    %54 = arith.subf %33, %20 : vector<8x1xf32>
    %55 = math.exp %54 : vector<8x1xf32>
    %56 = arith.subf %25, %55 : vector<8x1xf32>
    %c1_i32 = arith.constant 1 : i32
    %c0_i32_19 = arith.constant 0 : i32
    %57 = arith.addi %c0_i32_19, %c1_i32 : i32
    %58 = vector.broadcast %cst_14 : f32 to vector<8x8xf32>
    %59 = arith.select %53, %11, %58 : vector<8x8xi1>, vector<8x8xf32>
    %cst_20 = arith.constant dense<0xFF800000> : vector<8xf32>
    %60 = vector.multi_reduction <maximumf>, %59, %cst_20 [1] : vector<8x8xf32> to vector<8xf32>
    %61 = vector.shape_cast %60 : vector<8xf32> to vector<8x1xf32>
    %62 = arith.subf %61, %20 : vector<8x1xf32>
    %63 = arith.addf %37, %62 : vector<8x1xf32>
    %64 = math.log %56 : vector<8x1xf32>
    %65 = arith.subf %63, %64 : vector<8x1xf32>
    %66 = vector.broadcast %61 : vector<8x1xf32> to vector<8x8xf32>
    %67 = arith.cmpf oge, %59, %66 : vector<8x8xf32>
    %c8_i32_21 = arith.constant 8 : i32
    %68 = vector.broadcast %c8_i32_21 : i32 to vector<8x8xi32>
    %69 = arith.select %67, %17, %68 : vector<8x8xi1>, vector<8x8xi32>
    %cst_22 = arith.constant dense<2147483647> : vector<8xi32>
    %70 = vector.multi_reduction <minsi>, %69, %cst_22 [1] : vector<8x8xi32> to vector<8xi32>
    %71 = vector.shape_cast %70 : vector<8xi32> to vector<8x1xi32>
    %72 = vector.broadcast %57 : i32 to vector<1x128xi32>
    %73 = arith.cmpi eq, %18, %72 : vector<1x128xi32>
    %74 = vector.shape_cast %73 : vector<1x128xi1> to vector<1x128xi1>
    %75 = vector.broadcast %74 : vector<1x128xi1> to vector<8x128xi1>
    %76 = vector.shape_cast %71 : vector<8x1xi32> to vector<8x1xi32>
    %77 = vector.broadcast %76 : vector<8x1xi32> to vector<8x128xi32>
    %78 = arith.select %75, %77, %50 : vector<8x128xi1>, vector<8x128xi32>
    %79 = vector.broadcast %71 : vector<8x1xi32> to vector<8x8xi32>
    %80 = arith.cmpi ne, %17, %79 : vector<8x8xi32>
    %81 = arith.andi %53, %80 : vector<8x8xi1>
    %82 = arith.subf %61, %20 : vector<8x1xf32>
    %83 = math.exp %82 : vector<8x1xf32>
    %84 = arith.subf %56, %83 : vector<8x1xf32>
    %c2_i32 = arith.constant 2 : i32
    %c0_i32_23 = arith.constant 0 : i32
    %85 = arith.addi %c0_i32_23, %c2_i32 : i32
    %86 = vector.broadcast %cst_14 : f32 to vector<8x8xf32>
    %87 = arith.select %81, %11, %86 : vector<8x8xi1>, vector<8x8xf32>
    %cst_24 = arith.constant dense<0xFF800000> : vector<8xf32>
    %88 = vector.multi_reduction <maximumf>, %87, %cst_24 [1] : vector<8x8xf32> to vector<8xf32>
    %89 = vector.shape_cast %88 : vector<8xf32> to vector<8x1xf32>
    %90 = arith.subf %89, %20 : vector<8x1xf32>
    %91 = arith.addf %65, %90 : vector<8x1xf32>
    %92 = math.log %84 : vector<8x1xf32>
    %93 = arith.subf %91, %92 : vector<8x1xf32>
    %94 = vector.broadcast %89 : vector<8x1xf32> to vector<8x8xf32>
    %95 = arith.cmpf oge, %87, %94 : vector<8x8xf32>
    %c8_i32_25 = arith.constant 8 : i32
    %96 = vector.broadcast %c8_i32_25 : i32 to vector<8x8xi32>
    %97 = arith.select %95, %17, %96 : vector<8x8xi1>, vector<8x8xi32>
    %cst_26 = arith.constant dense<2147483647> : vector<8xi32>
    %98 = vector.multi_reduction <minsi>, %97, %cst_26 [1] : vector<8x8xi32> to vector<8xi32>
    %99 = vector.shape_cast %98 : vector<8xi32> to vector<8x1xi32>
    %100 = vector.broadcast %85 : i32 to vector<1x128xi32>
    %101 = arith.cmpi eq, %18, %100 : vector<1x128xi32>
    %102 = vector.shape_cast %101 : vector<1x128xi1> to vector<1x128xi1>
    %103 = vector.broadcast %102 : vector<1x128xi1> to vector<8x128xi1>
    %104 = vector.shape_cast %99 : vector<8x1xi32> to vector<8x1xi32>
    %105 = vector.broadcast %104 : vector<8x1xi32> to vector<8x128xi32>
    %106 = arith.select %103, %105, %78 : vector<8x128xi1>, vector<8x128xi32>
    %107 = vector.broadcast %99 : vector<8x1xi32> to vector<8x8xi32>
    %108 = arith.cmpi ne, %17, %107 : vector<8x8xi32>
    %109 = arith.andi %81, %108 : vector<8x8xi1>
    %110 = arith.subf %89, %20 : vector<8x1xf32>
    %111 = math.exp %110 : vector<8x1xf32>
    %112 = arith.subf %84, %111 : vector<8x1xf32>
    %c3_i32 = arith.constant 3 : i32
    %c0_i32_27 = arith.constant 0 : i32
    %113 = arith.addi %c0_i32_27, %c3_i32 : i32
    %114 = vector.broadcast %cst_14 : f32 to vector<8x8xf32>
    %115 = arith.select %109, %11, %114 : vector<8x8xi1>, vector<8x8xf32>
    %cst_28 = arith.constant dense<0xFF800000> : vector<8xf32>
    %116 = vector.multi_reduction <maximumf>, %115, %cst_28 [1] : vector<8x8xf32> to vector<8xf32>
    %117 = vector.shape_cast %116 : vector<8xf32> to vector<8x1xf32>
    %118 = arith.subf %117, %20 : vector<8x1xf32>
    %119 = arith.addf %93, %118 : vector<8x1xf32>
    %120 = math.log %112 : vector<8x1xf32>
    %121 = arith.subf %119, %120 : vector<8x1xf32>
    %122 = vector.broadcast %117 : vector<8x1xf32> to vector<8x8xf32>
    %123 = arith.cmpf oge, %115, %122 : vector<8x8xf32>
    %c8_i32_29 = arith.constant 8 : i32
    %124 = vector.broadcast %c8_i32_29 : i32 to vector<8x8xi32>
    %125 = arith.select %123, %17, %124 : vector<8x8xi1>, vector<8x8xi32>
    %cst_30 = arith.constant dense<2147483647> : vector<8xi32>
    %126 = vector.multi_reduction <minsi>, %125, %cst_30 [1] : vector<8x8xi32> to vector<8xi32>
    %127 = vector.shape_cast %126 : vector<8xi32> to vector<8x1xi32>
    %128 = vector.broadcast %113 : i32 to vector<1x128xi32>
    %129 = arith.cmpi eq, %18, %128 : vector<1x128xi32>
    %130 = vector.shape_cast %129 : vector<1x128xi1> to vector<1x128xi1>
    %131 = vector.broadcast %130 : vector<1x128xi1> to vector<8x128xi1>
    %132 = vector.shape_cast %127 : vector<8x1xi32> to vector<8x1xi32>
    %133 = vector.broadcast %132 : vector<8x1xi32> to vector<8x128xi32>
    %134 = arith.select %131, %133, %106 : vector<8x128xi1>, vector<8x128xi32>
    %135 = vector.broadcast %127 : vector<8x1xi32> to vector<8x8xi32>
    %136 = arith.cmpi ne, %17, %135 : vector<8x8xi32>
    %137 = arith.andi %109, %136 : vector<8x8xi1>
    %138 = arith.subf %117, %20 : vector<8x1xf32>
    %139 = math.exp %138 : vector<8x1xf32>
    %140 = arith.subf %112, %139 : vector<8x1xf32>
    %c4_i32 = arith.constant 4 : i32
    %cst_31 = arith.constant dense<0.000000e+00> : vector<8xf32>
    %141 = vector.multi_reduction <add>, %16, %cst_31 [1] : vector<8x8xf32> to vector<8xf32>
    %142 = vector.shape_cast %141 : vector<8xf32> to vector<8x1xf32>
    %cst_32 = arith.constant 0.000000e+00 : f32
    %143 = vector.broadcast %cst_32 : f32 to vector<8x8xf32>
    %144 = arith.select %137, %143, %16 : vector<8x8xi1>, vector<8x8xf32>
    %cst_33 = arith.constant dense<0.000000e+00> : vector<8xf32>
    %145 = vector.multi_reduction <add>, %144, %cst_33 [1] : vector<8x8xf32> to vector<8xf32>
    %146 = vector.shape_cast %145 : vector<8xf32> to vector<8x1xf32>
    %147 = arith.subf %142, %146 : vector<8x1xf32>
    %148 = tpu.iota {dimensions = array<i32: 1>} : vector<8x128xi32>
    %c0_i32_34 = arith.constant 0 : i32
    %149 = vector.broadcast %c0_i32_34 : i32 to vector<8x128xi32>
    %150 = arith.cmpi eq, %148, %149 : vector<8x128xi32>
    %cst_35 = arith.constant 0.000000e+00 : f32
    %151 = vector.shape_cast %146 : vector<8x1xf32> to vector<8x1xf32>
    %152 = vector.broadcast %151 : vector<8x1xf32> to vector<8x128xf32>
    %153 = vector.broadcast %cst_35 : f32 to vector<8x128xf32>
    %154 = arith.select %150, %152, %153 : vector<8x128xi1>, vector<8x128xf32>
    %c1_i32_36 = arith.constant 1 : i32
    %155 = vector.broadcast %c1_i32_36 : i32 to vector<8x128xi32>
    %156 = arith.cmpi eq, %148, %155 : vector<8x128xi32>
    %cst_37 = arith.constant 0.000000e+00 : f32
    %157 = vector.shape_cast %121 : vector<8x1xf32> to vector<8x1xf32>
    %158 = vector.broadcast %157 : vector<8x1xf32> to vector<8x128xf32>
    %159 = vector.broadcast %cst_37 : f32 to vector<8x128xf32>
    %160 = arith.select %156, %158, %159 : vector<8x128xi1>, vector<8x128xf32>
    %161 = arith.addf %154, %160 : vector<8x128xf32>
    %c2_i32_38 = arith.constant 2 : i32
    %162 = vector.broadcast %c2_i32_38 : i32 to vector<8x128xi32>
    %163 = arith.cmpi eq, %148, %162 : vector<8x128xi32>
    %cst_39 = arith.constant 0.000000e+00 : f32
    %164 = vector.shape_cast %147 : vector<8x1xf32> to vector<8x1xf32>
    %165 = vector.broadcast %164 : vector<8x1xf32> to vector<8x128xf32>
    %166 = vector.broadcast %cst_39 : f32 to vector<8x128xf32>
    %167 = arith.select %163, %165, %166 : vector<8x128xi1>, vector<8x128xf32>
    %168 = arith.addf %161, %167 : vector<8x128xf32>
    %c0_40 = arith.constant 0 : index
    %c0_41 = arith.constant 0 : index
    %169 = vector.load %arg4[%c0_40, %c0_41] : memref<8x128xf32, #tpu.memory_space<vmem>>, vector<8x128xf32>
    tpu.vector_store %arg4[%c0_40, %c0_41], %168 {strides = array<i32>} : memref<8x128xf32, #tpu.memory_space<vmem>>, vector<8x128xf32>,
    %c0_42 = arith.constant 0 : index
    %c0_43 = arith.constant 0 : index
    %170 = vector.load %arg5[%c0_42, %c0_43] : memref<8x128xi32, #tpu.memory_space<vmem>>, vector<8x128xi32>
    tpu.vector_store %arg5[%c0_42, %c0_43], %134 {strides = array<i32>} : memref<8x128xi32, #tpu.memory_space<vmem>>, vector<8x128xi32>,
    return
  }
  func.func @transform_0(%arg0: i32) -> (i32, i32, i32) {
    %c0_i32 = arith.constant 0 : i32
    %c0_i32_0 = arith.constant 0 : i32
    %c0_i32_1 = arith.constant 0 : i32
    return %arg0, %c0_i32, %c0_i32_0 : i32, i32, i32
  }
  func.func @transform_1(%arg0: i32) -> (i32, i32) {
    %c0_i32 = arith.constant 0 : i32
    %c0_i32_0 = arith.constant 0 : i32
    %c0_i32_1 = arith.constant 0 : i32
    return %c0_i32, %c0_i32_0 : i32, i32
  }
  func.func @transform_2(%arg0: i32) -> (i32, i32) {
    %c0_i32 = arith.constant 0 : i32
    %c0_i32_0 = arith.constant 0 : i32
    %c0_i32_1 = arith.constant 0 : i32
    return %c0_i32, %c0_i32_0 : i32, i32
  }
  func.func @transform_3(%arg0: i32) -> (i32, i32) {
    %c0_i32 = arith.constant 0 : i32
    %c0_i32_0 = arith.constant 0 : i32
    return %arg0, %c0_i32 : i32, i32
  }
  func.func @transform_4(%arg0: i32) -> (i32, i32) {
    %c0_i32 = arith.constant 0 : i32
    %c0_i32_0 = arith.constant 0 : i32
    return %arg0, %c0_i32 : i32, i32
  }
}

</mosaic_0001>

<bundles_post_ra>
// kernel: tpu_custom_call.1
= control target key start
LH: loop header
LB: loop body
LE: loop exit
PB: predicated region body
PF: predicated region fallthrough
CT: control target
= control target key end

     0   :  { %10 = vsyncpa [#allocation3], 0  ;;  %s1459_s0 = inlined_call_operand.hbm [shape: f32[8,8,32], index: 0, kind: input, shape index: {}]   ;;  %s1460_s1 = inlined_call_operand.hbm [shape: f32[32,32], index: 1, kind: input, shape index: {}]   ;;  %s1461_s2 = inlined_call_operand.vmem [shape: f32[1,32], index: 2, kind: input, shape index: {}]   ;;  %s1462_s3 = inlined_call_operand.hbm [shape: f32[8,128], index: 3, kind: output, shape index: {0}]   ;;  %s1463_s4 = inlined_call_operand.hbm [shape: s32[8,128], index: 4, kind: output, shape index: {1}]  }
   0x1   :  { %11 = vsyncpa [#allocation6], 0 }
   0x2   :  { %12 = vsyncpa [#allocation4], 0 }
   0x3   :  { %13 = vsyncpa [#allocation9], 0  ;;  %s1049_s15 = smov [#allocation2]   ;;  %s953_s19 = scalar_lea.hbm %s1459_s0, 1024 }
   0x4   :  { %s19_s16 = sshll.u32 %s1049_s15, 4  ;;  %p954_p0 = scmp.ne.s32.totalorder %s1459_s0, %s953_s19  ;;  %s20_s16 = int_to_ptr.vmem [resolvable:$true] %s19_s16 }
   0x5   :  { %p957_p1 = scmp.lt.u32.totalorder %s953_s19, %s1459_s0 }
   0x7   :  { %p959_p2 = pnand %p957_p1, %p954_p0 }
   0x9   :  { %962 = shalt.err (!%p959_p2)
}
   0xa   :  { %s963_s24 = scalar_lea.vmem %s20_s16, 1024  ;;  %p968_p4 = scmp.lt.s32.totalorder %s20_s16, %s20_s16 }
   0xb   :  { %p964_p3 = scmp.ne.s32.totalorder %s20_s16, %s963_s24  ;;  %p969_p5 = scmp.lt.s32.totalorder %s963_s24, %s963_s24 }
   0xd   :  { %p970_p6 = por %p969_p5, %p968_p4 }
   0xf   :  { %p971_p7 = pnand %p970_p6, %p964_p3 }
  0x11   :  { %974 = shalt.err (!%p971_p7)
}
  0x12   :  { %s1050_s25 = smov 128   ;;  %s1051_s26 = smov 8  }
  0x13   :  { %25 = dma.hbm_to_vmem [thread:$0]  %s1459_s0, 1024, %s20_s16, [#allocation3], %s1050_s25, %s1050_s25, %s1051_s26  }
  0x14   :  { %s1052_s29 = smov [#allocation5]   ;;  %s975_s7 = scalar_lea.hbm %s1460_s1, 512 }
  0x15   :  { %s31_s30 = sshll.u32 %s1052_s29, 4  ;;  %p976_p8 = scmp.ne.s32.totalorder %s1460_s1, %s975_s7  ;;  %s32_s30 = int_to_ptr.vmem [resolvable:$true] %s31_s30 }
  0x16   :  { %p979_p9 = scmp.lt.u32.totalorder %s975_s7, %s1460_s1 }
  0x18   :  { %p981_p10 = pnand %p979_p9, %p976_p8 }
  0x1a   :  { %984 = shalt.err (!%p981_p10)
}
  0x1b   :  { %s985_s12 = scalar_lea.vmem %s32_s30, 512  ;;  %p990_p12 = scmp.lt.s32.totalorder %s32_s30, %s32_s30 }
  0x1c   :  { %p986_p11 = scmp.ne.s32.totalorder %s32_s30, %s985_s12  ;;  %p991_p13 = scmp.lt.s32.totalorder %s985_s12, %s985_s12 }
  0x1e   :  { %p992_p0 = por %p991_p13, %p990_p12 }
  0x20   :  { %p993_p1 = pnand %p992_p0, %p986_p11 }
  0x22   :  { %996 = shalt.err (!%p993_p1)
}
  0x23   :  { %37 = dma.hbm_to_vmem [thread:$0]  %s1460_s1, 512, %s32_s30, [#allocation6], %s1050_s25, %s1050_s25, %s1051_s26  }
  0x24   :  { %1041 = dma.done.wait [#allocation3], 1024  }
  0x25   :  { %1042 = vsyncadd [#allocation3], 4294966272 }
  0x26   :  { %1043 = dma.done.wait [#allocation6], 512  }
  0x27   :  { %1044 = vsyncadd [#allocation6], 4294966784  ;;  %v1053_v0 = vmov 0.0|0.0   ;;  %vm1054_vm0 = vmmov 0   ;;  %v1055_v1 = vmov 0.0   ;;  %vm54_vm1 = vcmask 261120  }
  0x28   :  { %904 = vmatprep.subr.bf16.mxu0 %v1053_v0  ;;  %901 = vmatprep.mubr.msk.f32.mxu0 %vm1054_vm0, %v1055_v1  ;;  %v120_v2 = vld [vmem:[#allocation5] sm:$0xff]  ;;  %v121_v3 = vld [vmem:[#allocation5 + $0x8] sm:$0xff]  ;;  %v122_v4 = vld [vmem:[#allocation5 + $0x10] sm:$0xff]  ;;  %vm132_vm2 = vcmask 1041409   ;;  %vm134_vm3 = vcmask 1042434   ;;  %vm136_vm4 = vcmask 1043459  }
  0x29   :  { %v905_v5 = vpack.c.bf16 %v121_v3, %v120_v2  ;;  %v123_v6 = vld [vmem:[#allocation5 + $0x18] sm:$0xff]  ;;  %v1109_v7 = vld [vmem:[#allocation2] sm:$0xff]  ;;  %v1111_v8 = vld [vmem:[#allocation2 + $0x8] sm:$0xff]  ;;  %vm138_vm5 = vcmask 1044484   ;;  %vm140_vm6 = vcmask 1045509   ;;  %vm142_vm7 = vcmask 1046534  }
  0x2a   :  { %v1113_v9 = vld [vmem:[#allocation2 + $0x10] sm:$0xff]  ;;  %v1115_v10 = vld [vmem:[#allocation2 + $0x18] sm:$0xff]  ;;  %v1117_v11 = vld [vmem:[#allocation2 + $0x20] sm:$0xff]  ;;  %v55_v12 = vsel %vm54_vm1, %v1109_v7, 0.0  ;;  %v62_v13 = vsel %vm54_vm1, %v1111_v8, 0.0  ;;  %v908_v14 = vpack.c.bf16 %v123_v6, %v122_v4  ;;  %vm144_vm8 = vcmask 1047559  }
  0x2b   :  { %906 = vmatpush3.bf16.msra.mxu0 %v905_v5  ;;  %v1123_v15 = vld [vmem:[#allocation2 + $0x28] sm:$0xff]  ;;  %v1125_v16 = vld [vmem:[#allocation2 + $0x30] sm:$0xff]  ;;  %v1127_v17 = vld [vmem:[#allocation2 + $0x38] sm:$0xff]  ;;  %v56_v18 = vrot.slane %v55_v12, 4  ;;  %v63_v19 = vrot.slane %v62_v13, 4  ;;  %v69_v20 = vsel %vm54_vm1, %v1113_v9, 0.0 }
  0x2c   :  { %907 = vmatprep.subr.bf16.mxu0 %v1053_v0  ;;  %v70_v21 = vrot.slane %v69_v20, 4  ;;  %v76_v22 = vsel %vm54_vm1, %v1115_v10, 0.0  ;;  %v83_v23 = vsel %vm54_vm1, %v1117_v11, 0.0  ;;  %v90_v24 = vsel %vm54_vm1, %v1123_v15, 0.0 }
  0x2d   :  { %v57_v25 = vadd.f32 %v56_v18, %v55_v12  ;;  %v64_v26 = vadd.f32 %v63_v19, %v62_v13  ;;  %v77_v27 = vrot.slane %v76_v22, 4  ;;  %v84_v28 = vrot.slane %v83_v23, 4 }
  0x2e   :  { %v71_v29 = vadd.f32 %v70_v21, %v69_v20  ;;  %v91_v30 = vrot.slane %v90_v24, 4  ;;  %v97_v31 = vsel %vm54_vm1, %v1125_v16, 0.0  ;;  %v104_v32 = vsel %vm54_vm1, %v1127_v17, 0.0 }
  0x2f   :  { %909 = vmatpush3.bf16.msra.mxu0 %v908_v14  ;;  %v58_v33 = vrot.slane %v57_v25, 2  ;;  %v65_v34 = vrot.slane %v64_v26, 2  ;;  %v78_v35 = vadd.f32 %v77_v27, %v76_v22  ;;  %v85_v36 = vadd.f32 %v84_v28, %v83_v23 }
  0x30   :  { %v72_v37 = vrot.slane %v71_v29, 2  ;;  %v92_v38 = vadd.f32 %v91_v30, %v90_v24  ;;  %v98_v39 = vrot.slane %v97_v31, 4  ;;  %v105_v40 = vrot.slane %v104_v32, 4 }
  0x31   :  { %v59_v41 = vadd.f32 %v58_v33, %v57_v25  ;;  %v66_v42 = vadd.f32 %v65_v34, %v64_v26  ;;  %v79_v43 = vrot.slane %v78_v35, 2  ;;  %v86_v44 = vrot.slane %v85_v36, 2 }
  0x32   :  { %v73_v45 = vadd.f32 %v72_v37, %v71_v29  ;;  %v93_v46 = vrot.slane %v92_v38, 2  ;;  %v99_v47 = vadd.f32 %v98_v39, %v97_v31  ;;  %v106_v48 = vadd.f32 %v105_v40, %v104_v32 }
  0x33   :  { %v60_v49 = vrot.slane %v59_v41, 1  ;;  %v67_v50 = vrot.slane %v66_v42, 1  ;;  %v80_v51 = vadd.f32 %v79_v43, %v78_v35  ;;  %v87_v52 = vadd.f32 %v86_v44, %v85_v36 }
  0x34   :  { %v74_v53 = vrot.slane %v73_v45, 1  ;;  %v94_v54 = vadd.f32 %v93_v46, %v92_v38  ;;  %v100_v55 = vrot.slane %v99_v47, 2  ;;  %v107_v56 = vrot.slane %v106_v48, 2 }
  0x35   :  { %v61_v57 = vadd.f32 %v60_v49, %v59_v41  ;;  %v68_v58 = vadd.f32 %v67_v50, %v66_v42  ;;  %v81_v59 = vrot.slane %v80_v51, 1  ;;  %v88_v60 = vrot.slane %v87_v52, 1 }
  0x36   :  { %v75_v61 = vadd.f32 %v74_v53, %v73_v45  ;;  %v95_v62 = vrot.slane %v94_v54, 1  ;;  %v101_v63 = vadd.f32 %v100_v55, %v99_v47  ;;  %v108_v0 = vadd.f32 %v107_v56, %v106_v48 }
  0x37   :  { %v82_v1 = vadd.f32 %v81_v59, %v80_v51  ;;  %v89_v2 = vadd.f32 %v88_v60, %v87_v52  ;;  %v112_v3 = vmul.f32 0.125, %v61_v57  ;;  %v113_v4 = vmul.f32 0.125, %v68_v58 }
  0x38   :  { %v96_v5 = vadd.f32 %v95_v62, %v94_v54  ;;  %v102_v6 = vrot.slane %v101_v63, 1  ;;  %v109_v12 = vrot.slane %v108_v0, 1  ;;  %v114_v13 = vmul.f32 0.125, %v75_v61 }
  0x39   :  { %v115_v14 = vmul.f32 0.125, %v82_v1  ;;  %v116_v18 = vmul.f32 0.125, %v89_v2  ;;  %v133_v19 = vsel %vm132_vm2, %v113_v4, %v112_v3  ;;  %v1056_v31 = vmov 1966171168  }
  0x3a   :  { %v103_v20 = vadd.f32 %v102_v6, %v101_v63  ;;  %v110_v21 = vadd.f32 %v109_v12, %v108_v0  ;;  %v117_v22 = vmul.f32 0.125, %v96_v5  ;;  %v135_v23 = vsel %vm134_vm3, %v114_v13, %v133_v19 }
  0x3b   :  { %v137_v24 = vsel %vm136_vm4, %v115_v14, %v135_v23  ;;  %v221_v32 = vunpack.c.l.s4 %v1056_v31  ;;  %v223_v33 = vlaneseq  ;;  %vm437_vm9 = vcmask 64512  }
  0x3c   :  { %v118_v25 = vmul.f32 0.125, %v103_v20  ;;  %v119_v26 = vmul.f32 0.125, %v110_v21  ;;  %v139_v27 = vsel %vm138_vm5, %v116_v18, %v137_v24 }
  0x3d   :  { %v141_v28 = vsel %vm140_vm6, %v117_v22, %v139_v27  ;;  %v222_v34 = vunpack.c.0.s8 %v221_v32  ;;  %v1149_v35 = vshrl.u32 %v223_v33, 7  ;;  %v1179_v21 = vand.u32 127, %v223_v33 }
  0x3e   :  { %v143_v29 = vsel %vm142_vm7, %v118_v25, %v141_v28 }
  0x3f   :  { %v145_v30 = vsel %vm144_vm8, %v119_v26, %v143_v29  ;;  %v225_v36 = vsub.s32 %v222_v34, %v1149_v35  ;;  %v1153_v41 = vsub.s32 0, %v1149_v35  ;;  %v1184_v23 = vsub.s32 %v1179_v21, %v1149_v35 }
  0x40   :  { %902 = vmatmul.mubr.msk.f32.vlgmr.msra.gmra.mrb[0].mxu0 %vm54_vm1, %v145_v30 }
 0x113   :  { %v214_v37 = vpop.f32.mrb[0].mxu0 }
 0x114   :  { %v219_v38 = vcombine.high %v214_v37, %v214_v37  ;;  %v226_v39 = vrot.slane %v214_v37, %v225_v36  ;;  %v903_v40 = vpop.f32.mrb[1].mxu0 }
 0x116   :  { %v233_v42 = vrot.slane %v219_v38, %v225_v36  ;;  %v234_v43 = vcombine.high %v226_v39, %v226_v39  ;;  %v242_v44 = vrot.slane %v226_v39, %v225_v36 }
 0x118   :  { %v235_v45 = vcombine.high %v233_v42, %v233_v42  ;;  %v249_v46 = vrot.slane %v233_v42, %v225_v36  ;;  %v256_v47 = vrot.slane %v234_v43, %v225_v36  ;;  %v271_v48 = vrot.slane %v242_v44, %v1153_v41 }
 0x119   :  { %v264_v49 = vcombine.high %v242_v44, %v242_v44 }
 0x11a   :  { %v308_v50 = vmul.f32 %v271_v48, %v1109_v7  ;;  %v275_v51 = vrot.slane %v256_v47, %v1153_v41  ;;  %v266_v52 = vcombine.high %v256_v47, %v256_v47  ;;  %v287_v54 = vrot.slane %v249_v46, %v1153_v41 }
 0x11b   :  { %v279_v53 = vrot.slane %v264_v49, %v1153_v41  ;;  %v263_v55 = vrot.slane %v235_v45, %v225_v36  ;;  %v265_v59 = vcombine.high %v249_v46, %v249_v46 }
 0x11c   :  { %v316_v56 = vsel %vm54_vm1, %v308_v50, 0.0  ;;  %v309_v57 = vmul.f32 %v275_v51, %v1111_v8  ;;  %v283_v58 = vrot.slane %v266_v52, %v1153_v41  ;;  %v312_v2 = vmul.f32 %v287_v54, %v1117_v11 }
 0x11d   :  { %317 = vadd.xlane.f32.xlu0 %v316_v56  ;;  %v310_v60 = vmul.f32 %v279_v53, %v1113_v9  ;;  %v291_v63 = vrot.slane %v263_v55, %v1153_v41  ;;  %v267_v0 = vcombine.high %v263_v55, %v263_v55  ;;  %v295_v3 = vrot.slane %v265_v59, %v1153_v41 }
 0x11e   :  { %v311_v62 = vmul.f32 %v283_v58, %v1115_v10  ;;  %v319_v1 = vsel %vm54_vm1, %v309_v57, 0.0  ;;  %v328_v12 = vsel %vm54_vm1, %v312_v2, 0.0  ;;  %v1057_v57 = vmov 0  }
 0x11f   :  { %v322_v61 = vsel %vm54_vm1, %v310_v60, 0.0  ;;  %v313_v5 = vmul.f32 %v291_v63, %v1123_v15  ;;  %v299_v6 = vrot.slane %v267_v0, %v1153_v41  ;;  %v314_v13 = vmul.f32 %v295_v3, %v1125_v16  ;;  %922 = vset.pattern.permute.xlu1 %v1057_v57  ;;  %921 = vset.pattern.permute.xlu0 %v1057_v57 }
 0x120   :  { %323 = vadd.xlane.f32.xlu1 %v322_v61  ;;  %v325_v4 = vsel %vm54_vm1, %v311_v62, 0.0  ;;  %v448_v58 = vsub.s32 1, %v1149_v35  ;;  %v452_v59 = vsub.s32 2, %v1149_v35 }
 0x121   :  { %320 = vadd.xlane.f32.xlu0 %v319_v1  ;;  %v331_v14 = vsel %vm54_vm1, %v313_v5, 0.0  ;;  %v315_v18 = vmul.f32 %v299_v6, %v1127_v17  ;;  %v334_v19 = vsel %vm54_vm1, %v314_v13, 0.0  ;;  %v456_v1 = vsub.s32 3, %v1149_v35 }
 0x123   :  { %v337_v20 = vsel %vm54_vm1, %v315_v18, 0.0  ;;  %v468_v18 = vsub.s32 6, %v1149_v35 }
 0x124   :  { %326 = vadd.xlane.f32.xlu1 %v325_v4  ;;  %v460_v4 = vsub.s32 4, %v1149_v35 }
 0x125   :  { %329 = vadd.xlane.f32.xlu0 %v328_v12  ;;  %v464_v12 = vsub.s32 5, %v1149_v35 }
 0x128   :  { %332 = vadd.xlane.f32.xlu1 %v331_v14 }
 0x129   :  { %335 = vadd.xlane.f32.xlu0 %v334_v19 }
 0x12c   :  { %338 = vadd.xlane.f32.xlu1 %v337_v20 }
 0x13d   :  { %595 = vbcast.lane.b32.xlu1 %v1179_v21, 256 }
 0x1aa   :  { %v318_v22 = vpop.xlane.xlu0 %317 }
 0x1ab   :  { %v1186_v24 = vmul.f32 0.17677669, %v318_v22  ;;  %v472_v22 = vsub.s32 7, %v1149_v35 }
 0x1ad   :  { %v324_v25 = vpop.xlane.xlu1 %323  ;;  %v400_v29 = vrot.slane %v1186_v24, %v1184_v23 }
 0x1ae   :  { %v1188_v26 = vmul.f32 0.17677669, %v324_v25  ;;  %v321_v27 = vpop.xlane.xlu0 %320 }
 0x1af   :  { %v1190_v28 = vmul.f32 0.17677669, %v321_v27 }
 0x1b0   :  { %v408_v32 = vrot.slane %v1188_v26, %v1184_v23 }
 0x1b1   :  { %v404_v30 = vrot.slane %v1190_v28, %v1184_v23  ;;  %v327_v31 = vpop.xlane.xlu1 %326 }
 0x1b2   :  { %v1198_v33 = vmul.f32 0.17677669, %v327_v31  ;;  %v330_v34 = vpop.xlane.xlu0 %329 }
 0x1b3   :  { %v429_v36 = vsel %vm132_vm2, %v404_v30, %v400_v29  ;;  %v1201_v37 = vmul.f32 0.17677669, %v330_v34 }
 0x1b4   :  { %v430_v38 = vsel %vm134_vm3, %v408_v32, %v429_v36  ;;  %v412_v39 = vrot.slane %v1198_v33, %v1184_v23 }
 0x1b5   :  { %v416_v40 = vrot.slane %v1201_v37, %v1184_v23  ;;  %v333_v42 = vpop.xlane.xlu1 %332 }
 0x1b6   :  { %v431_v43 = vsel %vm136_vm4, %v412_v39, %v430_v38  ;;  %v1209_v44 = vmul.f32 0.17677669, %v333_v42  ;;  %v336_v45 = vpop.xlane.xlu0 %335 }
 0x1b7   :  { %v432_v46 = vsel %vm138_vm5, %v416_v40, %v431_v43  ;;  %v1212_v47 = vmul.f32 0.17677669, %v336_v45 }
 0x1b8   :  { %v420_v48 = vrot.slane %v1209_v44, %v1184_v23 }
 0x1b9   :  { %v424_v49 = vrot.slane %v1212_v47, %v1184_v23  ;;  %v339_v50 = vpop.xlane.xlu1 %338 }
 0x1ba   :  { %v1218_v51 = vmul.f32 0.17677669, %v339_v50  ;;  %v433_v52 = vsel %vm140_vm6, %v420_v48, %v432_v46 }
 0x1bb   :  { %v434_v53 = vsel %vm142_vm7, %v424_v49, %v433_v52 }
 0x1bc   :  { %v428_v54 = vrot.slane %v1218_v51, %v1184_v23 }
 0x1bd   :  { %v596_v61 = vpop.permute.xlu1 %595 }
 0x1be   :  { %v1225_v55 = vsel %vm144_vm8, %v428_v54, %v434_v53 }
 0x1bf   :  { %v438_v56 = vsel %vm437_vm9, %v1225_v55, -inf }
 0x1c0   :  { %439 = vmax.xlane.f32.xlu0 %v438_v56 }
 0x24d   :  { %v1231_v60 = vpop.xlane.xlu0 %439 }
 0x24e   :  { %v1234_v62 = vrot.slane %v1231_v60, %v448_v58  ;;  %v1238_v63 = vrot.slane %v1231_v60, %v1153_v41  ;;  %v1241_v0 = vrot.slane %v1231_v60, %v452_v59  ;;  %v1251_v41 = vrot.slane %v1231_v60, %v456_v1 }
 0x24f   :  { %v1257_v6 = vrot.slane %v1231_v60, %v460_v4  ;;  %v1263_v14 = vrot.slane %v1231_v60, %v464_v12  ;;  %v1269_v20 = vrot.slane %v1231_v60, %v468_v18  ;;  %v1275_v27 = vrot.slane %v1231_v60, %v472_v22 }
 0x250   :  { %vm587_vm10 = vcmp.ge.f32.partialorder %v1190_v28, %v1234_v62  ;;  %vm586_vm11 = vcmp.ge.f32.partialorder %v1186_v24, %v1238_v63  ;;  %vm588_vm12 = vcmp.ge.f32.partialorder %v1188_v26, %v1241_v0  ;;  %vm589_vm13 = vcmp.ge.f32.partialorder %v1198_v33, %v1251_v41 }
 0x251   :  { %v598_v2 = vsel %vm587_vm10, %v596_v61, 8  ;;  %v597_v3 = vsel %vm586_vm11, %v596_v61, 8  ;;  %v599_v5 = vsel %vm588_vm12, %v596_v61, 8  ;;  %v600_v13 = vsel %vm589_vm13, %v596_v61, 8 }
 0x252   :  { %609 = vperm.xlu1 %922, %v598_v2   ;;  %606 = vperm.xlu0 %921, %v597_v3   ;;  %vm590_vm14 = vcmp.ge.f32.partialorder %v1201_v37, %v1257_v6  ;;  %vm591_vm15 = vcmp.ge.f32.partialorder %v1209_v44, %v1263_v14  ;;  %vm592_vm0 = vcmp.ge.f32.partialorder %v1212_v47, %v1269_v20 }
 0x253   :  { %v601_v19 = vsel %vm590_vm14, %v596_v61, 8  ;;  %v602_v25 = vsel %vm591_vm15, %v596_v61, 8  ;;  %v603_v29 = vsel %vm592_vm0, %v596_v61, 8  ;;  %vm593_vm10 = vcmp.ge.f32.partialorder %v1218_v51, %v1275_v27 }
 0x254   :  { %v604_v30 = vsel %vm593_vm10, %v596_v61, 8  ;;  %vm683_vm15 = vcmp.eq.s32.totalorder %v1179_v21, 0  ;;  %vm717_vm0 = vcmp.eq.s32.totalorder %v1179_v21, 1 }
 0x256   :  { %612 = vperm.xlu1 %922, %v599_v5  }
 0x25a   :  { %615 = vperm.xlu1 %922, %v600_v13  }
 0x25e   :  { %618 = vperm.xlu1 %922, %v601_v19  }
 0x262   :  { %621 = vperm.xlu1 %922, %v602_v25  }
 0x266   :  { %624 = vperm.xlu1 %922, %v603_v29  }
 0x26a   :  { %627 = vperm.xlu1 %922, %v604_v30  }
 0x2d1   :  { %v610_v31 = vpop.permute.xlu1 %609  ;;  %v607_v35 = vpop.permute.xlu0 %606 }
 0x2d2   :  { %v636_v39 = vrot.slane %v610_v31, %v1184_v23  ;;  %v632_v40 = vrot.slane %v607_v35, %v1184_v23 }
 0x2d4   :  { %v661_v48 = vsel %vm132_vm2, %v636_v39, %v632_v40 }
 0x2d5   :  { %v613_v32 = vpop.permute.xlu1 %612 }
 0x2d6   :  { %v640_v42 = vrot.slane %v613_v32, %v1184_v23 }
 0x2d8   :  { %v662_v50 = vsel %vm134_vm3, %v640_v42, %v661_v48 }
 0x2d9   :  { %v616_v34 = vpop.permute.xlu1 %615 }
 0x2da   :  { %v644_v43 = vrot.slane %v616_v34, %v1184_v23 }
 0x2dc   :  { %v663_v53 = vsel %vm136_vm4, %v644_v43, %v662_v50 }
 0x2dd   :  { %v619_v36 = vpop.permute.xlu1 %618 }
 0x2de   :  { %v648_v45 = vrot.slane %v619_v36, %v1184_v23 }
 0x2e0   :  { %v664_v54 = vsel %vm138_vm5, %v648_v45, %v663_v53 }
 0x2e1   :  { %v622_v38 = vpop.permute.xlu1 %621 }
 0x2e2   :  { %v652_v49 = vrot.slane %v622_v38, %v1184_v23 }
 0x2e4   :  { %v665_v57 = vsel %vm140_vm6, %v652_v49, %v664_v54 }
 0x2e5   :  { %v625_v46 = vpop.permute.xlu1 %624 }
 0x2e6   :  { %v656_v52 = vrot.slane %v625_v46, %v1184_v23 }
 0x2e8   :  { %v666_v59 = vsel %vm142_vm7, %v656_v52, %v665_v57 }
 0x2e9   :  { %v628_v56 = vpop.permute.xlu1 %627 }
 0x2ea   :  { %v660_v58 = vrot.slane %v628_v56, %v1184_v23 }
 0x2ec   :  { %v667_v61 = vsel %vm144_vm8, %v660_v58, %v666_v59 }
 0x2ed   :  { %v668_v1 = vsel %vm437_vm9, %v667_v61, 2147483647 }
 0x2ee   :  { %v670_v2 = vshra.s32 %v668_v1, 16  ;;  %v669_v4 = vand.u32 65535, %v668_v1 }
 0x2f0   :  { %v672_v3 = vcvt.s32.f32 %v670_v2  ;;  %v671_v12 = vcvt.s32.f32 %v669_v4 }
 0x2f2   :  { %673 = vmin.xlane.f32.xlu1 %v672_v3 }
 0x37f   :  { %v674_v5 = vpop.xlane.xlu1 %673 }
 0x380   :  { %vm675_vm11 = vcmp.eq.f32.partialorder %v672_v3, %v674_v5  ;;  %v680_v18 = vcvt.f32.s32 %v674_v5 }
 0x381   :  { %v676_v13 = vsel %vm675_vm11, %v671_v12, inf }
 0x382   :  { %677 = vmin.xlane.f32.xlu0 %v676_v13  ;;  %v681_v22 = vshll.u32 %v680_v18, 16 }
 0x40f   :  { %v678_v19 = vpop.xlane.xlu0 %677 }
 0x410   :  { %v679_v25 = vcvt.f32.s32 %v678_v19 }
 0x412   :  { %v682_v29 = vadd.s32 %v681_v22, %v679_v25 }
 0x414   :  { %vm687_vm12 = vcmp.ne.s32.totalorder %v1179_v21, %v682_v29  ;;  %v686_v52 = vsel %vm683_vm15, %v682_v29, 0 }
 0x415   :  { %v691_v30 = vsel %vm687_vm12, %v1225_v55, -1e+30 }
 0x416   :  { %v692_v31 = vsel %vm437_vm9, %v691_v30, -inf }
 0x417   :  { %693 = vmax.xlane.f32.xlu0 %v692_v31 }
 0x4a4   :  { %v1300_v32 = vpop.xlane.xlu0 %693 }
 0x4a5   :  { %vm700_vm13 = vcmp.ge.f32.partialorder %v691_v30, %v1300_v32 }
 0x4a6   :  { %v701_v34 = vsel %vm700_vm13, %v1179_v21, 8 }
 0x4a7   :  { %v702_v36 = vsel %vm437_vm9, %v701_v34, 2147483647 }
 0x4a8   :  { %v704_v35 = vshra.s32 %v702_v36, 16  ;;  %v703_v39 = vand.u32 65535, %v702_v36  ;;  %v482_v36 = vsub.f32 %v1186_v24, %v1238_v63 }
 0x4aa   :  { %v706_v38 = vcvt.s32.f32 %v704_v35  ;;  %v705_v42 = vcvt.s32.f32 %v703_v39  ;;  %v490_v35 = vmul.f32 1.442695, %v482_v36 }
 0x4ac   :  { %707 = vmin.xlane.f32.xlu1 %v706_v38  ;;  %923 = vpow2.f32 %v490_v35 }
 0x539   :  { %v708_v40 = vpop.xlane.xlu1 %707 }
 0x53a   :  { %vm709_vm14 = vcmp.eq.f32.partialorder %v706_v38, %v708_v40  ;;  %v714_v45 = vcvt.f32.s32 %v708_v40  ;;  %v485_v38 = vsub.f32 %v1198_v33, %v1251_v41  ;;  %v487_v40 = vsub.f32 %v1209_v44, %v1263_v14  ;;  %v887_v44 = vld [vmem:[%s1461_s2] ss:$0 sm:$0xff]  ;;  %s1058_s2 = smov [#allocation8]  }
 0x53b   :  { %v710_v43 = vsel %vm709_vm14, %v705_v42, inf  ;;  %vm752_vm14 = vcmp.eq.s32.totalorder %v1179_v21, 2  ;;  %v356_v41 = vmul.f32 %v887_v44, %v1111_v8  ;;  %s872_s15 = sshll.u32 %s1058_s2, 4  ;;  %s873_s15 = int_to_ptr.vmem [resolvable:$true] %s872_s15 }
 0x53c   :  { %711 = vmin.xlane.f32.xlu0 %v710_v43  ;;  %v715_v48 = vshll.u32 %v714_v45, 16  ;;  %v496_v39 = vmul.f32 1.442695, %v485_v38  ;;  %v500_v42 = vmul.f32 1.442695, %v487_v40  ;;  %v924_v45 = vpop.eup %923  ;;  %s997_s16 = scalar_lea.vmem %s873_s15, 128  ;;  %p1002_p3 = scmp.lt.s32.totalorder %s873_s15, %s873_s15 }
 0x53d   :  { %v366_v14 = vsel %vm54_vm1, %v356_v41, 0.0  ;;  %p998_p2 = scmp.ne.s32.totalorder %s873_s15, %s997_s16  ;;  %p1003_p4 = scmp.lt.s32.totalorder %s997_s16, %s997_s16 }
 0x53e   :  { %925 = vpow2.f32 %v496_v39 }
 0x53f   :  { %927 = vpow2.f32 %v500_v42  ;;  %p1004_p5 = por %p1003_p4, %p1002_p3 }
 0x541   :  { %p1005_p6 = pnand %p1004_p5, %p998_p2 }
 0x548   :  { %v926_v24 = vpop.eup %925 }
 0x549   :  { %v928_v63 = vpop.eup %927 }
 0x5c9   :  { %v712_v46 = vpop.xlane.xlu0 %711 }
 0x5ca   :  { %v713_v49 = vcvt.f32.s32 %v712_v46  ;;  %v359_v46 = vmul.f32 %v887_v44, %v1117_v11  ;;  %v483_v11 = vsub.f32 %v1190_v28, %v1234_v62  ;;  %v362_v62 = vmul.f32 %v887_v44, %v1127_v17 }
 0x5cc   :  { %v716_v50 = vadd.s32 %v715_v48, %v713_v49  ;;  %v375_v48 = vsel %vm54_vm1, %v359_v46, 0.0  ;;  %v360_v49 = vmul.f32 %v887_v44, %v1123_v15  ;;  %v484_v15 = vsub.f32 %v1188_v26, %v1241_v0 }
 0x5cd   :  { %v384_v26 = vsel %vm54_vm1, %v362_v62, 0.0 }
 0x5ce   :  { %vm721_vm10 = vcmp.ne.s32.totalorder %v1179_v21, %v716_v50  ;;  %v720_v53 = vsel %vm717_vm0, %v716_v50, %v686_v52  ;;  %v378_v50 = vsel %vm54_vm1, %v360_v49, 0.0 }
 0x5cf   :  { %vm1314_vm11 = vmand %vm687_vm12, %vm721_vm10 }
 0x5d0   :  { %v726_v56 = vsel %vm1314_vm11, %v1225_v55, -1e+30 }
 0x5d1   :  { %v727_v57 = vsel %vm437_vm9, %v726_v56, -inf }
 0x5d2   :  { %728 = vmax.xlane.f32.xlu1 %v727_v57  ;;  %v494_v57 = vmul.f32 1.442695, %v484_v15 }
 0x65f   :  { %v1322_v58 = vpop.xlane.xlu1 %728 }
 0x660   :  { %vm735_vm13 = vcmp.ge.f32.partialorder %v726_v56, %v1322_v58  ;;  %v492_v56 = vmul.f32 1.442695, %v483_v11 }
 0x661   :  { %v736_v59 = vsel %vm735_vm13, %v1179_v21, 8 }
 0x662   :  { %v737_v61 = vsel %vm437_vm9, %v736_v59, 2147483647  ;;  %v486_v59 = vsub.f32 %v1201_v37, %v1257_v6  ;;  %v355_v6 = vmul.f32 %v887_v44, %v1109_v7 }
 0x663   :  { %v739_v1 = vshra.s32 %v737_v61, 16  ;;  %v738_v3 = vand.u32 65535, %v737_v61 }
 0x664   :  { %v498_v61 = vmul.f32 1.442695, %v486_v59 }
 0x665   :  { %v741_v2 = vcvt.s32.f32 %v739_v1  ;;  %v740_v5 = vcvt.s32.f32 %v738_v3  ;;  %v488_v1 = vsub.f32 %v1212_v47, %v1269_v20  ;;  %v363_v47 = vsel %vm54_vm1, %v355_v6, 0.0 }
 0x666   :  { %v358_v20 = vmul.f32 %v887_v44, %v1115_v10 }
 0x667   :  { %742 = vmin.xlane.f32.xlu0 %v741_v2 }
 0x6f4   :  { %v743_v4 = vpop.xlane.xlu0 %742 }
 0x6f5   :  { %vm744_vm12 = vcmp.eq.f32.partialorder %v741_v2, %v743_v4  ;;  %v749_v13 = vcvt.f32.s32 %v743_v4  ;;  %v502_v2 = vmul.f32 1.442695, %v488_v1  ;;  %v372_v4 = vsel %vm54_vm1, %v358_v20, 0.0 }
 0x6f6   :  { %v745_v12 = vsel %vm744_vm12, %v740_v5, inf }
 0x6f7   :  { %746 = vmin.xlane.f32.xlu1 %v745_v12  ;;  %v750_v19 = vshll.u32 %v749_v13, 16 }
 0x784   :  { %v747_v18 = vpop.xlane.xlu1 %746 }
 0x785   :  { %v748_v22 = vcvt.f32.s32 %v747_v18  ;;  %v361_v18 = vmul.f32 %v887_v44, %v1125_v16 }
 0x787   :  { %v751_v25 = vadd.s32 %v750_v19, %v748_v22  ;;  %v381_v7 = vsel %vm54_vm1, %v361_v18, 0.0 }
 0x789   :  { %vm756_vm10 = vcmp.ne.s32.totalorder %v1179_v21, %v751_v25  ;;  %v1331_v29 = vsel %vm752_vm14, %v751_v25, %v720_v53 }
 0x78a   :  { %vm1335_vm13 = vmand %vm1314_vm11, %vm756_vm10 }
 0x78b   :  { %v761_v31 = vsel %vm1335_vm13, %v1225_v55, -1e+30  ;;  %v489_v55 = vsub.f32 %v1218_v51, %v1275_v27  ;;  %v357_v51 = vmul.f32 %v887_v44, %v1113_v9 }
 0x78c   :  { %v762_v34 = vsel %vm437_vm9, %v761_v31, -inf }
 0x78d   :  { %763 = vmax.xlane.f32.xlu0 %v762_v34  ;;  %v504_v43 = vmul.f32 1.442695, %v489_v55  ;;  %v369_v27 = vsel %vm54_vm1, %v357_v51, 0.0  ;;  %vm787_vm1 = vcmp.eq.s32.totalorder %v1179_v21, 3 }
 0x78f   :  { %929 = vpow2.f32 %v504_v43 }
 0x790   :  { %931 = vpow2.f32 %v492_v56 }
 0x791   :  { %933 = vpow2.f32 %v494_v57 }
 0x792   :  { %935 = vpow2.f32 %v498_v61 }
 0x793   :  { %937 = vpow2.f32 %v502_v2 }
 0x799   :  { %v930_v33 = vpop.eup %929 }
 0x79a   :  { %v932_v3 = vpop.eup %931 }
 0x79b   :  { %v934_v28 = vpop.eup %933 }
 0x79c   :  { %v936_v0 = vpop.eup %935 }
 0x79d   :  { %v938_v37 = vpop.eup %937 }
 0x7a3   :  { %515 = vperm.xlu0 %921, %v924_v45  }
 0x7a7   :  { %524 = vperm.xlu0 %921, %v926_v24  }
 0x7ab   :  { %530 = vperm.xlu0 %921, %v928_v63  }
 0x7af   :  { %536 = vperm.xlu0 %921, %v930_v33  }
 0x7ce   :  { %367 = vadd.xlane.f32.xlu0 %v366_v14 }
 0x7d2   :  { %370 = vadd.xlane.f32.xlu0 %v369_v27 }
 0x7d6   :  { %376 = vadd.xlane.f32.xlu0 %v375_v48 }
 0x7da   :  { %379 = vadd.xlane.f32.xlu0 %v378_v50 }
 0x7de   :  { %385 = vadd.xlane.f32.xlu0 %v384_v26 }
 0x81a   :  { %v1362_v52 = vpop.xlane.xlu0 %763 }
 0x81b   :  { %vm770_vm11 = vcmp.ge.f32.partialorder %v761_v31, %v1362_v52 }
 0x81c   :  { %v771_v8 = vsel %vm770_vm11, %v1179_v21, 8 }
 0x81d   :  { %v772_v9 = vsel %vm437_vm9, %v771_v8, 2147483647 }
 0x81e   :  { %v774_v53 = vshra.s32 %v772_v9, 16  ;;  %v773_v5 = vand.u32 65535, %v772_v9 }
 0x820   :  { %v776_v54 = vcvt.s32.f32 %v774_v53  ;;  %v775_v13 = vcvt.s32.f32 %v773_v5 }
 0x822   :  { %777 = vmin.xlane.f32.xlu1 %v776_v54  ;;  %v516_v17 = vpop.permute.xlu0 %515 }
 0x823   :  { %v541_v10 = vrot.slane %v516_v17, %v1184_v23 }
 0x826   :  { %v525_v22 = vpop.permute.xlu0 %524 }
 0x827   :  { %v553_v39 = vrot.slane %v525_v22, %v1184_v23 }
 0x82a   :  { %v531_v36 = vpop.permute.xlu0 %530 }
 0x82b   :  { %v561_v24 = vrot.slane %v531_v36, %v1184_v23 }
 0x82e   :  { %v537_v43 = vpop.permute.xlu0 %536 }
 0x82f   :  { %v569_v44 = vrot.slane %v537_v43, %v1184_v23 }
 0x833   :  { %518 = vperm.xlu1 %922, %v932_v3  }
 0x837   :  { %521 = vperm.xlu1 %922, %v934_v28  }
 0x83b   :  { %527 = vperm.xlu1 %922, %v936_v0  }
 0x83f   :  { %533 = vperm.xlu1 %922, %v938_v37  }
 0x85b   :  { %v368_v46 = vpop.xlane.xlu0 %367 }
 0x85c   :  { %v808_v50 = vrot.slane %v368_v46, %v1184_v23 }
 0x85f   :  { %v371_v48 = vpop.xlane.xlu0 %370 }
 0x860   :  { %v812_v53 = vrot.slane %v371_v48, %v1184_v23 }
 0x863   :  { %364 = vadd.xlane.f32.xlu1 %v363_v47  ;;  %v377_v9 = vpop.xlane.xlu0 %376 }
 0x864   :  { %v820_v61 = vrot.slane %v377_v9, %v1184_v23 }
 0x867   :  { %373 = vadd.xlane.f32.xlu1 %v372_v4  ;;  %v380_v59 = vpop.xlane.xlu0 %379 }
 0x868   :  { %v824_v26 = vrot.slane %v380_v59, %v1184_v23 }
 0x86b   :  { %v386_v62 = vpop.xlane.xlu0 %385 }
 0x86c   :  { %v832_v47 = vrot.slane %v386_v62, %v1184_v23 }
 0x8af   :  { %v778_v12 = vpop.xlane.xlu1 %777 }
 0x8b0   :  { %vm779_vm12 = vcmp.eq.f32.partialorder %v776_v54, %v778_v12  ;;  %v784_v15 = vcvt.f32.s32 %v778_v12 }
 0x8b1   :  { %v780_v19 = vsel %vm779_vm12, %v775_v13, inf }
 0x8b2   :  { %781 = vmin.xlane.f32.xlu1 %v780_v19  ;;  %v785_v3 = vshll.u32 %v784_v15, 16 }
 0x8b3   :  { %v519_v25 = vpop.permute.xlu1 %518 }
 0x8b4   :  { %v545_v31 = vrot.slane %v519_v25, %v1184_v23 }
 0x8b6   :  { %382 = vadd.xlane.f32.xlu1 %v381_v7  ;;  %v570_v38 = vsel %vm132_vm2, %v545_v31, %v541_v10 }
 0x8b7   :  { %v522_v34 = vpop.permute.xlu1 %521 }
 0x8b8   :  { %v549_v35 = vrot.slane %v522_v34, %v1184_v23 }
 0x8ba   :  { %v571_v16 = vsel %vm134_vm3, %v549_v35, %v570_v38 }
 0x8bb   :  { %v528_v40 = vpop.permute.xlu1 %527  ;;  %v572_v55 = vsel %vm136_vm4, %v553_v39, %v571_v16 }
 0x8bc   :  { %v557_v42 = vrot.slane %v528_v40, %v1184_v23 }
 0x8be   :  { %v573_v45 = vsel %vm138_vm5, %v557_v42, %v572_v55 }
 0x8bf   :  { %v534_v63 = vpop.permute.xlu1 %533  ;;  %v574_v41 = vsel %vm140_vm6, %v561_v24, %v573_v45 }
 0x8c0   :  { %v565_v33 = vrot.slane %v534_v63, %v1184_v23 }
 0x8c2   :  { %v575_v14 = vsel %vm142_vm7, %v565_v33, %v574_v41 }
 0x8c3   :  { %v576_v51 = vsel %vm144_vm8, %v569_v44, %v575_v14 }
 0x8c4   :  { %v578_v27 = vsel %vm437_vm9, %v576_v51, 0.0 }
 0x8c5   :  { %579 = vadd.xlane.f32.xlu1 %v578_v27 }
 0x8f0   :  { %v365_v49 = vpop.xlane.xlu1 %364 }
 0x8f1   :  { %v804_v8 = vrot.slane %v365_v49, %v1184_v23 }
 0x8f3   :  { %v833_v54 = vsel %vm132_vm2, %v808_v50, %v804_v8 }
 0x8f4   :  { %v374_v11 = vpop.xlane.xlu1 %373  ;;  %v834_v57 = vsel %vm134_vm3, %v812_v53, %v833_v54 }
 0x8f5   :  { %v816_v56 = vrot.slane %v374_v11, %v1184_v23 }
 0x8f7   :  { %v835_v1 = vsel %vm136_vm4, %v816_v56, %v834_v57 }
 0x8f8   :  { %v836_v0 = vsel %vm138_vm5, %v820_v61, %v835_v1 }
 0x8f9   :  { %v837_v5 = vsel %vm140_vm6, %v824_v26, %v836_v0 }
 0x93f   :  { %v782_v2 = vpop.xlane.xlu1 %781 }
 0x940   :  { %v783_v28 = vcvt.f32.s32 %v782_v2 }
 0x942   :  { %v786_v37 = vadd.s32 %v785_v3, %v783_v28 }
 0x943   :  { %v383_v6 = vpop.xlane.xlu1 %382 }
 0x944   :  { %v828_v20 = vrot.slane %v383_v6, %v1184_v23  ;;  %vm791_vm2 = vcmp.ne.s32.totalorder %v1179_v21, %v786_v37  ;;  %v790_v4 = vsel %vm787_vm1, %v786_v37, %v1331_v29 }
 0x945   :  { %855 = vst [vmem:[#allocation8] sm:$0xff] %v790_v4  ;;  %vm792_vm3 = vmand %vm1335_vm13, %vm791_vm2 }
 0x946   :  { %v838_v17 = vsel %vm142_vm7, %v828_v20, %v837_v5 }
 0x947   :  { %v839_v12 = vsel %vm144_vm8, %v832_v47, %v838_v17 }
 0x948   :  { %v841_v13 = vsel %vm437_vm9, %v839_v12, 0.0  ;;  %v844_v18 = vsel %vm792_vm3, 0.0, %v839_v12 }
 0x949   :  { %842 = vadd.xlane.f32.xlu0 %v841_v13  ;;  %v845_v23 = vsel %vm437_vm9, %v844_v18, 0.0 }
 0x94a   :  { %846 = vadd.xlane.f32.xlu1 %v845_v23 }
 0x94b   :  { %1008 = shalt.err (!%p1005_p6)
}
 0x94c   :  { %s1009_s19 = scalar_lea.hbm %s1463_s4, 128 }
 0x94d   :  { %p1010_p7 = scmp.ne.s32.totalorder %s1463_s4, %s1009_s19  ;;  %p1013_p8 = scmp.lt.u32.totalorder %s1009_s19, %s1463_s4 }
 0x94f   :  { %p1015_p9 = pnand %p1013_p8, %p1010_p7 }
 0x951   :  { %1018 = shalt.err (!%p1015_p9)
}
 0x952   :  { %875 = dma.vmem_to_hbm [thread:$0]  %s873_s15, 128, %s1463_s4, [#allocation9]   ;;  %v581_v29 = vsub.f32 %v1231_v60, %v1231_v60  ;;  %v695_v19 = vsub.f32 %v1300_v32, %v1231_v60  ;;  %v580_v22 = vpop.xlane.xlu1 %579  ;;  %v730_v7 = vsub.f32 %v1322_v58, %v1231_v60  ;;  %v765_v44 = vsub.f32 %v1362_v52, %v1231_v60 }
 0x953   :  { %s1059_s4 = smov [#allocation7]  }
 0x954   :  { %v688_v30 = vmul.f32 1.442695, %v581_v29  ;;  %v723_v25 = vmul.f32 1.442695, %v695_v19  ;;  %v758_v34 = vmul.f32 1.442695, %v730_v7 }
 0x955   :  { %s862_s26 = sshll.u32 %s1059_s4, 4  ;;  %s863_s26 = int_to_ptr.vmem [resolvable:$true] %s862_s26 }
 0x956   :  { %939 = vpow2.f32 %v688_v30  ;;  %s1019_s27 = scalar_lea.vmem %s863_s26, 128  ;;  %p1024_p11 = scmp.lt.s32.totalorder %s863_s26, %s863_s26 }
 0x957   :  { %941 = vlog2.f32 %v580_v22  ;;  %p1020_p10 = scmp.ne.s32.totalorder %s863_s26, %s1019_s27  ;;  %p1025_p12 = scmp.lt.s32.totalorder %s1019_s27, %s1019_s27 }
 0x958   :  { %943 = vpow2.f32 %v723_v25 }
 0x959   :  { %p1026_p13 = por %p1025_p12, %p1024_p11 }
 0x95b   :  { %p1027_p0 = pnand %p1026_p13, %p1020_p10 }
 0x960   :  { %v940_v31 = vpop.eup %939 }
 0x961   :  { %v690_v10 = vsub.f32 %v580_v22, %v940_v31  ;;  %v942_v36 = vpop.eup %941 }
 0x962   :  { %v944_v35 = vpop.eup %943  ;;  %v584_v38 = vmul.f32 0.6931472, %v942_v36 }
 0x963   :  { %945 = vlog2.f32 %v690_v10  ;;  %v725_v16 = vsub.f32 %v690_v10, %v944_v35 }
 0x964   :  { %947 = vpow2.f32 %v758_v34  ;;  %v585_v39 = vsub.f32 %v581_v29, %v584_v38 }
 0x965   :  { %949 = vlog2.f32 %v725_v16 }
 0x966   :  { %v696_v42 = vadd.f32 %v695_v19, %v585_v39 }
 0x96d   :  { %v946_v32 = vpop.eup %945 }
 0x96e   :  { %v948_v40 = vpop.eup %947  ;;  %v698_v43 = vmul.f32 0.6931472, %v946_v32 }
 0x96f   :  { %v760_v55 = vsub.f32 %v725_v16, %v948_v40  ;;  %v950_v24 = vpop.eup %949 }
 0x970   :  { %v699_v45 = vsub.f32 %v696_v42, %v698_v43  ;;  %v733_v63 = vmul.f32 0.6931472, %v950_v24 }
 0x971   :  { %951 = vlog2.f32 %v760_v55 }
 0x972   :  { %v731_v58 = vadd.f32 %v730_v7, %v699_v45 }
 0x974   :  { %v734_v33 = vsub.f32 %v731_v58, %v733_v63 }
 0x976   :  { %v766_v14 = vadd.f32 %v765_v44, %v734_v33 }
 0x97b   :  { %v952_v41 = vpop.eup %951 }
 0x97c   :  { %v768_v51 = vmul.f32 0.6931472, %v952_v41 }
 0x97e   :  { %v769_v27 = vsub.f32 %v766_v14, %v768_v51 }
 0x980   :  { %v850_v8 = vsel %vm717_vm0, %v769_v27, 0.0 }
 0x9d6   :  { %v843_v46 = vpop.xlane.xlu0 %842 }
 0x9d7   :  { %v847_v48 = vpop.xlane.xlu1 %846 }
 0x9d8   :  { %v848_v49 = vsub.f32 %v843_v46, %v847_v48  ;;  %v849_v50 = vsel %vm683_vm15, %v847_v48, 0.0 }
 0x9d9   :  { %v851_v9 = vadd.f32 %v850_v8, %v849_v50 }
 0x9da   :  { %v852_v53 = vsel %vm752_vm14, %v848_v49, 0.0 }
 0x9db   :  { %v853_v60 = vadd.f32 %v852_v53, %v851_v9 }
 0x9dd   :  { %854 = vst [vmem:[#allocation7] sm:$0xff] %v853_v60 }
 0x9de   :  { %1030 = shalt.err (!%p1027_p0)
}
 0x9df   :  { %s1031_s30 = scalar_lea.hbm %s1462_s3, 128 }
 0x9e0   :  { %p1032_p1 = scmp.ne.s32.totalorder %s1462_s3, %s1031_s30  ;;  %p1035_p2 = scmp.lt.u32.totalorder %s1031_s30, %s1462_s3 }
 0x9e2   :  { %p1037_p3 = pnand %p1035_p2, %p1032_p1 }
 0x9e4   :  { %1040 = shalt.err (!%p1037_p3)
}
 0x9e5   :  { %865 = dma.vmem_to_hbm [thread:$0]  %s863_s26, 128, %s1462_s3, [#allocation4]  }
 0x9e6   :  { %1045 = dma.done.wait [#allocation4], 128  }
 0x9e7   :  { %1046 = vsyncadd [#allocation4], 4294967168 }
 0x9e8   :  { %1047 = dma.done.wait [#allocation9], 128  }
 0x9e9   :  { %1048 = vsyncadd [#allocation9], 4294967168 }
 0x9ea   :  { %882 = vsyncpa [#allocation3], 1 }
 0x9eb   :  { %883 = vsyncpa [#allocation6], 1 }
 0x9ec   :  { %884 = vsyncpa [#allocation4], 1 }
 0x9ed   :  { %885 = vsyncpa [#allocation9], 1 }

</bundles_post_ra>
